<compile_context>
chip_gen: v6e
topology: v6e:2x2x1
jax: 0.10.0
libtpu: 0.0.40
codegen_flags: <defaults>
</compile_context>

<pallas_src>
import functools

import jax
import jax.numpy as jnp
from jax.experimental import pallas as pl
from jax.experimental.pallas import tpu as pltpu


LANE = 128  # TPU lane width; pad the action dim to this for lane-dense stores.


def _mlp_kernel(x_ref, w1_ref, b1_ref, w2_ref, b2_ref, o_ref):
    # x arrives as f32 and is cast to bf16 in-kernel, so the wrapper never
    # materializes a separate bf16 copy of x in HBM.
    x = x_ref[...].astype(w1_ref.dtype)                               # [tb, D_in] bf16
    h = jnp.dot(x, w1_ref[...], preferred_element_type=jnp.float32)   # [tb, H] f32 (MXU)
    h = jnp.maximum(h + b1_ref[...], 0.0)                             # bias + ReLU (f32)
    h = h.astype(w2_ref.dtype)                                        # bf16 feed for 2nd MXU pass
    y = jnp.dot(h, w2_ref[...], preferred_element_type=jnp.float32)   # [tb, A_pad] f32
    o_ref[...] = (y + b2_ref[...]).astype(o_ref.dtype)                # bf16 lane-dense store


@functools.partial(jax.jit, static_argnames=("num_actions", "tile_b", "min_steps"))
def action_network_forward(x, w1, b1, w2, b2, num_actions, *, tile_b=4096, min_steps=2):
    """x: [B, D_in] f32; w1: [D_in, H] bf16; b1: [1, H] f32;
    w2: [H, A_pad] bf16 (lane-padded); b2: [1, A_pad] f32.
    Returns [B, num_actions] f32 (bf16-rounded values)."""
    B, D_in = x.shape
    H = w1.shape[1]
    A_pad = w2.shape[1]

    # Cap the tile so the grid has >= min_steps steps (lets the "parallel"
    # batch axis shard across v7x's 2 TensorCores), keep it a multiple of 8
    # sublanes, never below 8.
    tile_b = min(tile_b, pl.cdiv(B, min_steps))
    tile_b = max(8, pl.cdiv(tile_b, 8) * 8)

    # Ragged batches: no explicit pad -- the boundary block's OOB output rows
    # are dropped by the pipeline, and garbage input rows only affect those
    # dropped rows (each output row depends on its own input row only).
    grid = (pl.cdiv(B, tile_b),)

    out = pl.pallas_call(
        _mlp_kernel,
        out_shape=jax.ShapeDtypeStruct((B, A_pad), jnp.bfloat16),
        grid_spec=pltpu.PrefetchScalarGridSpec(
            num_scalar_prefetch=0,
            grid=grid,
            in_specs=[
                pl.BlockSpec((tile_b, D_in), lambda i: (i, 0)),  # streamed x tile (f32)
                pl.BlockSpec((D_in, H), lambda i: (0, 0)),       # w1 (resident bf16)
                pl.BlockSpec((1, H), lambda i: (0, 0)),          # b1 (resident f32)
                pl.BlockSpec((H, A_pad), lambda i: (0, 0)),      # w2 (resident, lane-padded bf16)
                pl.BlockSpec((1, A_pad), lambda i: (0, 0)),      # b2 (resident, lane-padded f32)
            ],
            out_specs=pl.BlockSpec((tile_b, A_pad), lambda i: (i, 0)),  # lane-dense bf16 slab
        ),
        compiler_params=pltpu.CompilerParams(
            dimension_semantics=("parallel",)),
    )(x, w1, b1, w2, b2)

    # Tiny slice + cast; fused by jit with the downstream consumer.
    return out[:, :num_actions].astype(jnp.float32)


def _orthogonal(key, rows, cols, dtype=jnp.float32):
    """Deterministic orthogonal init matching torch.nn.init.orthogonal_ semantics
    (rows of the [rows, cols] matrix are orthonormal when rows <= cols)."""
    n, m = (rows, cols) if rows >= cols else (cols, rows)
    a = jax.random.normal(key, (n, m), dtype=jnp.float32)
    q, r = jnp.linalg.qr(a)
    s = jnp.sign(jnp.diag(r))
    s = jnp.where(s == 0, 1.0, s)  # robustness: never zero a column
    q = q * s[None, :]
    w = q if rows >= cols else q.T
    return w.astype(dtype)


def init_params(key, input_dim=256, hidden=64, num_actions=9):
    """PyTorch-layout parameters: fc1_w [H, D_in], fc1_b [H], fc2_w [A, H], fc2_b [A]."""
    k1, k2, k3, k4 = jax.random.split(key, 4)
    fc1_w = _orthogonal(k1, hidden, input_dim)
    fc2_w = _orthogonal(k2, num_actions, hidden)
    bound1 = 1.0 / jnp.sqrt(jnp.float32(input_dim))
    bound2 = 1.0 / jnp.sqrt(jnp.float32(hidden))
    fc1_b = jax.random.uniform(k3, (hidden,), minval=-bound1, maxval=bound1)
    fc2_b = jax.random.uniform(k4, (num_actions,), minval=-bound2, maxval=bound2)
    return fc1_w, fc1_b, fc2_w, fc2_b


def prepare_params(fc1_w, fc1_b, fc2_w, fc2_b, compute_dtype=jnp.bfloat16):
    """Convert PyTorch-layout params to kernel layout:
    transpose to [in, out], cast weights to bf16, lane-pad the action dim to 128,
    keep f32 biases as [1, out] rows."""
    H, D_in = fc1_w.shape
    A = fc2_w.shape[0]
    A_pad = pl.cdiv(A, LANE) * LANE

    w1 = fc1_w.T.astype(compute_dtype)                             # [D_in, H]
    b1 = fc1_b[None, :].astype(jnp.float32)                        # [1, H]
    w2 = jnp.zeros((H, A_pad), compute_dtype).at[:, :A].set(
        fc2_w.T.astype(compute_dtype))                             # [H, A_pad]
    b2 = jnp.zeros((1, A_pad), jnp.float32).at[:, :A].set(
        fc2_b[None, :].astype(jnp.float32))                        # [1, A_pad]
    return w1, b1, w2, b2, A


def reference_forward_kernel_precision(x, fc1_w, fc1_b, fc2_w, fc2_b):
    """Pure-JAX reference mirroring the kernel's precision choices:
    bf16-rounded x / weights / hidden activation, f32 accumulation."""
    xr = x.astype(jnp.bfloat16).astype(jnp.float32)
    w1r = fc1_w.astype(jnp.bfloat16).astype(jnp.float32)
    w2r = fc2_w.astype(jnp.bfloat16).astype(jnp.float32)
    h = jnp.maximum(xr @ w1r.T + fc1_b[None, :], 0.0)
    h = h.astype(jnp.bfloat16).astype(jnp.float32)  # kernel rounds hidden to bf16
    return h @ w2r.T + fc2_b[None, :]


if __name__ == "__main__":
    key = jax.random.PRNGKey(0)
    kx, kp = jax.random.split(key)

    # Small, module-consistent shapes; ragged batch (30) exercises the
    # boundary-block path (no explicit pad in the wrapper).
    B, D_IN, HID, NA = 30, 256, 64, 9
    x = jax.random.normal(kx, (B, D_IN), dtype=jnp.float32)
    fc1_w, fc1_b, fc2_w, fc2_b = init_params(kp, D_IN, HID, NA)
    w1, b1, w2, b2, A = prepare_params(fc1_w, fc1_b, fc2_w, fc2_b)

    # min_steps=2 -> tile_b clamps to 16 here: a 2-step parallel grid with a
    # ragged tail block, while production batches use the big default tiles.
    out = action_network_forward(x, w1, b1, w2, b2, A)
    out = jax.block_until_ready(out)

    ref = reference_forward_kernel_precision(x, fc1_w, fc1_b, fc2_w, fc2_b)

    assert out.shape == (B, NA), out.shape
    # Output is stored as bf16 in the kernel, so allow bf16-level tolerance.
    assert jnp.allclose(out, ref, atol=2e-2, rtol=2e-2), "mismatch vs reference"

    print("KERNEL_OK")
</pallas_src>

<mosaic_0001>
module attributes {stable_mosaic.version = 11 : i64} {
  func.func @_mlp_kernel(%arg0: i32, %arg1: memref<16x256xf32, #tpu.memory_space<vmem>>, %arg2: memref<256x64xbf16, #tpu.memory_space<vmem>>, %arg3: memref<1x64xf32, #tpu.memory_space<vmem>>, %arg4: memref<64x128xbf16, #tpu.memory_space<vmem>>, %arg5: memref<1x128xf32, #tpu.memory_space<vmem>>, %arg6: memref<16x128xbf16, #tpu.memory_space<vmem>>) attributes {dimension_semantics = [#tpu.dimension_semantics<parallel>], iteration_bounds = array<i64: 2>, scalar_prefetch = 0 : i64, scratch_operands = 0 : i64, tpu.core_type = #tpu.core_type<tc>, window_params = [{transform_indices = @transform_0, window_bounds = array<i64: 16, 256>}, {pipeline_mode = #tpu.pipeline_mode<synchronous>, transform_indices = @transform_1, window_bounds = array<i64: 256, 64>}, {pipeline_mode = #tpu.pipeline_mode<synchronous>, transform_indices = @transform_2, window_bounds = array<i64: 1, 64>}, {pipeline_mode = #tpu.pipeline_mode<synchronous>, transform_indices = @transform_3, window_bounds = array<i64: 64, 128>}, {pipeline_mode = #tpu.pipeline_mode<synchronous>, transform_indices = @transform_4, window_bounds = array<i64: 1, 128>}, {transform_indices = @transform_5, window_bounds = array<i64: 16, 128>}]} {
    %c0 = arith.constant 0 : index
    %c0_0 = arith.constant 0 : index
    %0 = vector.load %arg1[%c0, %c0_0] : memref<16x256xf32, #tpu.memory_space<vmem>>, vector<16x256xf32>
    %1 = arith.truncf %0 : vector<16x256xf32> to vector<16x256xbf16>
    %c0_1 = arith.constant 0 : index
    %c0_2 = arith.constant 0 : index
    %2 = vector.load %arg2[%c0_1, %c0_2] : memref<256x64xbf16, #tpu.memory_space<vmem>>, vector<256x64xbf16>
    %cst = arith.constant dense<0.000000e+00> : vector<16x64xf32>
    %3 = tpu.matmul %1, %2, %cst {dimension_numbers = #tpu.dot_dimension_numbers<[1], [0], [0], [1], [0, 0, 1, 1], [], []>} : vector<16x256xbf16>, vector<256x64xbf16>, vector<16x64xf32> -> vector<16x64xf32>
    %c0_3 = arith.constant 0 : index
    %c0_4 = arith.constant 0 : index
    %4 = vector.load %arg3[%c0_3, %c0_4] : memref<1x64xf32, #tpu.memory_space<vmem>>, vector<1x64xf32>
    %5 = vector.broadcast %4 : vector<1x64xf32> to vector<16x64xf32>
    %6 = arith.addf %3, %5 : vector<16x64xf32>
    %cst_5 = arith.constant 0.000000e+00 : f32
    %7 = vector.broadcast %cst_5 : f32 to vector<16x64xf32>
    %8 = arith.maximumf %6, %7 : vector<16x64xf32>
    %9 = arith.truncf %8 : vector<16x64xf32> to vector<16x64xbf16>
    %c0_6 = arith.constant 0 : index
    %c0_7 = arith.constant 0 : index
    %10 = vector.load %arg4[%c0_6, %c0_7] : memref<64x128xbf16, #tpu.memory_space<vmem>>, vector<64x128xbf16>
    %cst_8 = arith.constant dense<0.000000e+00> : vector<16x128xf32>
    %11 = tpu.matmul %9, %10, %cst_8 {dimension_numbers = #tpu.dot_dimension_numbers<[1], [0], [0], [1], [0, 0, 1, 1], [], []>} : vector<16x64xbf16>, vector<64x128xbf16>, vector<16x128xf32> -> vector<16x128xf32>
    %c0_9 = arith.constant 0 : index
    %c0_10 = arith.constant 0 : index
    %12 = vector.load %arg5[%c0_9, %c0_10] : memref<1x128xf32, #tpu.memory_space<vmem>>, vector<1x128xf32>
    %13 = vector.broadcast %12 : vector<1x128xf32> to vector<16x128xf32>
    %14 = arith.addf %11, %13 : vector<16x128xf32>
    %15 = arith.truncf %14 : vector<16x128xf32> to vector<16x128xbf16>
    %c0_11 = arith.constant 0 : index
    %c0_12 = arith.constant 0 : index
    %16 = vector.load %arg6[%c0_11, %c0_12] : memref<16x128xbf16, #tpu.memory_space<vmem>>, vector<16x128xbf16>
    tpu.vector_store %arg6[%c0_11, %c0_12], %15 {strides = array<i32>} : memref<16x128xbf16, #tpu.memory_space<vmem>>, vector<16x128xbf16>,
    return
  }
  func.func @transform_0(%arg0: i32) -> (i32, i32) {
    %c0_i32 = arith.constant 0 : i32
    %c0_i32_0 = arith.constant 0 : i32
    return %arg0, %c0_i32 : i32, i32
  }
  func.func @transform_1(%arg0: i32) -> (i32, i32) {
    %c0_i32 = arith.constant 0 : i32
    %c0_i32_0 = arith.constant 0 : i32
    %c0_i32_1 = arith.constant 0 : i32
    return %c0_i32, %c0_i32_0 : i32, i32
  }
  func.func @transform_2(%arg0: i32) -> (i32, i32) {
    %c0_i32 = arith.constant 0 : i32
    %c0_i32_0 = arith.constant 0 : i32
    %c0_i32_1 = arith.constant 0 : i32
    return %c0_i32, %c0_i32_0 : i32, i32
  }
  func.func @transform_3(%arg0: i32) -> (i32, i32) {
    %c0_i32 = arith.constant 0 : i32
    %c0_i32_0 = arith.constant 0 : i32
    %c0_i32_1 = arith.constant 0 : i32
    return %c0_i32, %c0_i32_0 : i32, i32
  }
  func.func @transform_4(%arg0: i32) -> (i32, i32) {
    %c0_i32 = arith.constant 0 : i32
    %c0_i32_0 = arith.constant 0 : i32
    %c0_i32_1 = arith.constant 0 : i32
    return %c0_i32, %c0_i32_0 : i32, i32
  }
  func.func @transform_5(%arg0: i32) -> (i32, i32) {
    %c0_i32 = arith.constant 0 : i32
    %c0_i32_0 = arith.constant 0 : i32
    return %arg0, %c0_i32 : i32, i32
  }
}

</mosaic_0001>

<bundles_post_ra>
// kernel: action_network_forward.1
= control target key start
LH: loop header
LB: loop body
LE: loop exit
PB: predicated region body
PF: predicated region fallthrough
CT: control target
= control target key end

     0   :  { %s721_s18 = smov 0   ;;  %s808_s0 = inlined_call_operand.vmem [shape: f32[30,256], index: 0, kind: input, shape index: {}]   ;;  %s809_s1 = inlined_call_operand.vmem [shape: bf16[256,64], index: 1, kind: input, shape index: {}]   ;;  %s810_s2 = inlined_call_operand.vmem [shape: f32[1,64], index: 2, kind: input, shape index: {}]   ;;  %s811_s3 = inlined_call_operand.vmem [shape: bf16[64,128], index: 3, kind: input, shape index: {}]   ;;  %s812_s4 = inlined_call_operand.vmem [shape: f32[1,128], index: 4, kind: input, shape index: {}]   ;;  %s813_s5 = inlined_call_operand.vmem [shape: bf16[30,128], index: 5, kind: output, shape index: {}]  }
   0x1 LB: > { %s567_s19 = sadd.s32 4294967295, %s687_s18   ;;  %p571_p0 = scmp.ge.s32.totalorder %s687_s18, 1  ;;  %s687_s18 = sphi %s721_s18, %s15_s18  }
   0x2   : > { %p189_p1 = scmp.lt.s32.totalorder %s687_s18, 3 }
   0x4   : > { %p190_p2 = pnand %p571_p0, %p189_p1 }
   0x5   : > { %s572_s22 = sshll.u32 (!%p190_p2), %s567_s19, 1 }
   0x6   : > { %193 = sbr.rel (%p190_p2) target bundleno = 453 (0x1c5), region = 40  ;;  %p219_p3 = scmp.lt.s32.totalorder (!%p190_p2), %s572_s22, 3 }
   0xb   : > { %v661_v0 = vld [vmem:[%s809_s1 + $0x78] sm:$0xff]   ;;  %v663_v2 = vld [vmem:[%s809_s1 + $0x70] sm:$0xff]   ;;  %v689_v4 = vmov 0.0   ;;  %v665_v5 = vld [vmem:[%s809_s1 + $0x68] sm:$0xff]   ;;  %s815_s22 = smov (!%p219_p3, %s572_s22), 3  ;;  %vm690_vm0 = vmmov 0  }
   0xc   : > { %v662_v1 = vld [vmem:[%s809_s1 + $0x38] sm:$0xff]   ;;  %612 = vmatprep.subr.bf16.mxu0 %v661_v0  ;;  %v664_v3 = vld [vmem:[%s809_s1 + $0x30] sm:$0xff]   ;;  %639 = vmatprep.subr.bf16.mxu1 %v689_v4  ;;  %v666_v6 = vld [vmem:[%s809_s1 + $0x28] sm:$0xff]   ;;  %s604_s10 = sshll.u32 %s815_s22, 4  ;;  %vm456_vm1 = vcmask 523264   ;;  %s576_s23 = sshll.u32 %s815_s22, 2 }
   0xd   : > { %613 = vmatpush3.bf16.msra.mxu0 %v662_v1  ;;  %v667_v7 = vld [vmem:[%s809_s1 + $0x60] sm:$0xff]   ;;  %v669_v9 = vld [vmem:[%s809_s1 + $0x58] sm:$0xff]   ;;  %s223_s17 = scalar_lea.vmem %s808_s0, %s604_s10  ;;  %v671_v11 = vld [vmem:[%s809_s1 + $0x50] sm:$0xff]   ;;  %647 = vmatprep.mubr.msk.bf16.mxu1 %vm690_vm0, %v689_v4  ;;  %s229_s26 = scalar_lea.vmem %s813_s5, %s576_s23 }
   0xe   : > { %614 = vmatprep.subr.bf16.mxu0 %v663_v2  ;;  %v668_v8 = vld [vmem:[%s809_s1 + $0x20] sm:$0xff]   ;;  %v670_v10 = vld [vmem:[%s809_s1 + $0x18] sm:$0xff]   ;;  %v233_v12 = vld [vmem:[%s223_s17 + $0x8] sm:$0xff] }
   0xf   : > { %v235_v13 = vld [vmem:[%s223_s17 + $0x18] sm:$0xff]  ;;  %v672_v14 = vld [vmem:[%s809_s1 + $0x10] sm:$0xff]   ;;  %v673_v16 = vld [vmem:[%s809_s1 + $0x48] sm:$0xff]  }
  0x10   : > { %v237_v15 = vpack.c.bf16 %v235_v13, %v233_v12  ;;  %v674_v17 = vld [vmem:[%s809_s1 + $0x8] sm:$0xff]   ;;  %v675_v18 = vld [vmem:[%s809_s1 + $0x40] sm:$0xff]   ;;  %v234_v21 = vld [vmem:[%s223_s17 + $0x10] sm:$0xff] }
  0x11   : > { %615 = vmatpush3.bf16.msra.mxu0 %v664_v3  ;;  %v676_v19 = vld [vmem:[%s809_s1] sm:$0xff]   ;;  %v677_v23 = vld [vmem:[%s811_s3 + $0x18] sm:$0xff]   ;;  %v678_v24 = vld [vmem:[%s811_s3 + $0x10] sm:$0xff]  }
  0x12   : > { %616 = vmatprep.subr.bf16.mxu0 %v665_v5  ;;  %405 = vmatprep.mubr.bf16.mxu0 %v237_v15  ;;  %v232_v20 = vld [vmem:[%s223_s17] sm:$0xff]  ;;  %v679_v25 = vld [vmem:[%s811_s3 + $0x8] sm:$0xff]  }
  0x13   : > { %v236_v22 = vpack.c.bf16 %v234_v21, %v232_v20  ;;  %640 = vmatpush3.bf16.msra.mxu1 %v677_v23  ;;  %v680_v26 = vld [vmem:[%s811_s3] sm:$0xff]  }
  0x14   : > { %641 = vmatprep.subr.bf16.mxu1 %v689_v4  ;;  %v577_v30 = vld [vmem:[%s810_s2] ss:$0 sm:$0xff] }
  0x15   : > { %617 = vmatpush3.bf16.msra.mxu0 %v666_v6  ;;  %v594_v40 = vld [vmem:[%s812_s4] ss:$0 sm:$0xff] }
  0x16   : > { %618 = vmatprep.subr.bf16.mxu0 %v667_v7 }
  0x17   : > { %642 = vmatpush3.bf16.msra.mxu1 %v678_v24 }
  0x18   : > { %643 = vmatprep.subr.bf16.mxu1 %v689_v4 }
  0x19   : > { %619 = vmatpush3.bf16.msra.mxu0 %v668_v8 }
  0x1a   : > { %620 = vmatprep.subr.bf16.mxu0 %v669_v9 }
  0x1b   : > { %644 = vmatpush3.bf16.msra.mxu1 %v679_v25 }
  0x1c   : > { %645 = vmatprep.subr.bf16.mxu1 %v689_v4 }
  0x1d   : > { %621 = vmatpush3.bf16.msra.mxu0 %v670_v10 }
  0x1e   : > { %622 = vmatprep.subr.bf16.mxu0 %v671_v11 }
  0x1f   : > { %646 = vmatpush3.bf16.msra.mxu1 %v680_v26 }
  0x21   : > { %623 = vmatpush3.bf16.msra.mxu0 %v672_v14 }
  0x22   : > { %624 = vmatprep.subr.bf16.mxu0 %v673_v16 }
  0x25   : > { %625 = vmatpush3.bf16.msra.mxu0 %v674_v17 }
  0x26   : > { %626 = vmatprep.subr.bf16.mxu0 %v675_v18 }
  0x29   : > { %627 = vmatpush3.bf16.msra.mxu0 %v676_v19 }
  0x2c   : > { %406 = vmatmul.mubr.bf16.vlgmr.msra.gmra.mxu0 %v236_v22 }
  0xec   : > { %v628_v27 = vpop.f32.mrf.mxu0 }
  0xee   : > { %v629_v28 = vpop.f32.mrf.mxu0 }
  0xef   : > { %v630_v29 = vadd.f32 %v629_v28, %v628_v27 }
  0xf0   : > { %v631_v31 = vpop.f32.mrf.mxu0 }
  0xf1   : > { %v408_v33 = vadd.f32 %v630_v29, %v577_v30 }
  0xf2   : > { %v632_v32 = vpop.f32.mrf.mxu0 }
  0xf3   : > { %v633_v34 = vadd.f32 %v632_v32, %v631_v31  ;;  %v414_v36 = vmax.f32 %v408_v33, 0.0 }
  0xf5   : > { %v411_v35 = vadd.f32 %v633_v34, %v577_v30 }
  0xf7   : > { %v415_v37 = vmax.f32 %v411_v35, 0.0 }
  0xf9   : > { %v416_v38 = vpack.c.bf16 %v415_v37, %v414_v36 }
  0xfb   : > { %648 = vmatmul.mubr.msk.bf16.vlgmr.msra.gmra.mxu1 %vm456_vm1, %v416_v38 }
 0x1bb   : > { %v494_v39 = vpop.f32.mrf.mxu1 }
 0x1bc   : > { %v495_v43 = vadd.f32 %v594_v40, %v494_v39 }
 0x1bd   : > { %v649_v41 = vpop.f32.mrf.mxu1 }
 0x1bf   : > { %v497_v42 = vpop.f32.mrf.mxu1 }
 0x1c0   : > { %v498_v44 = vadd.f32 %v594_v40, %v497_v42 }
 0x1c1   : > { %v650_v45 = vpop.f32.mrf.mxu1 }
 0x1c2   : > { %v610_v46 = vpack.c.bf16 %v498_v44, %v495_v43 }
 0x1c4   : > { %611 = vst [vmem:[%s229_s26] sm:$0xff] %v610_v46  }
 0x1c5 PF: > { %s15_s18 = sadd.s32 1, %s687_s18  }
 0x1c6   : > { %p12_p4 = scmp.ge.s32.totalorder %s15_s18, 4  }
 0x1c8   :  { %14 = sbr.rel (!%p12_p4) target bundleno = 1 (0x1), region = 70 }

</bundles_post_ra>
